<compile_context>
chip_gen: v6e
topology: v6e:2x2x1
jax: 0.10.0
libtpu: 0.0.40
codegen_flags: <defaults>
</compile_context>

<pallas_src>
import math
import functools

import jax
import jax.numpy as jnp
from jax import lax
from jax.experimental import pallas as pl
from jax.experimental.pallas import tpu as pltpu


_INV_SQRT2 = 1.0 / math.sqrt(2.0)
_INV_SQRT2PI = 1.0 / math.sqrt(2.0 * math.pi)
# Contract the last dim of both operands: (tb, tk) x (tn, tk) -> (tb, tn).
_NT_DIMS = (((1,), (1,)), ((), ()))


def _relu_moments(mu, var):
    """Moment-matched ReLU of N(mu, var); all f32. rsqrt avoids sqrt + divide."""
    inv_sig = lax.rsqrt(var)
    sig = var * inv_sig
    alpha = mu * inv_sig
    cdf = 0.5 * (1.0 + lax.erf(alpha * _INV_SQRT2))
    pdf = _INV_SQRT2PI * jnp.exp(-0.5 * alpha * alpha)
    relu_mean = mu * cdf + sig * pdf
    relu_var = (var + mu * mu) * cdf + mu * sig * pdf - relu_mean * relu_mean
    return relu_mean, jnp.maximum(relu_var, 1e-8)


def _clt_kernel_with_var(mu_ref, var_ref, wmu_ref, s2w_ref, bias_ref,
                         mu_out_ref, var_out_ref, mu_acc, var_acc):
    k = pl.program_id(2)

    @pl.when(k == 0)
    def _init():
        mu_acc[...] = jnp.zeros_like(mu_acc)
        var_acc[...] = jnp.zeros_like(var_acc)

    mu_in = mu_ref[...]        # (tb, tk)   compute dtype (bf16 default)
    var_in = var_ref[...]      # (tb, tk)
    w_mu = wmu_ref[...]        # (tn, tk)   PyTorch layout (out x in)
    s2_w = s2w_ref[...]        # (tn, tk)   exp(logsig2_w), precomputed

    # Mean path: mu_in @ mu_w.T
    mu_acc[...] += lax.dot_general(mu_in, w_mu, _NT_DIMS,
                                   preferred_element_type=jnp.float32)
    # Variance path: (var_in + mu_in^2) @ s2_w.T + var_in @ (mu_w^2).T
    var_acc[...] += lax.dot_general(var_in + mu_in * mu_in, s2_w, _NT_DIMS,
                                    preferred_element_type=jnp.float32)
    var_acc[...] += lax.dot_general(var_in, w_mu * w_mu, _NT_DIMS,
                                    preferred_element_type=jnp.float32)

    @pl.when(k == pl.num_programs(2) - 1)
    def _finalize():
        mu_lin = mu_acc[...] + bias_ref[...]
        var_lin = var_acc[...] + 1e-8
        relu_mean, relu_var = _relu_moments(mu_lin, var_lin)
        mu_out_ref[...] = relu_mean.astype(mu_out_ref.dtype)
        var_out_ref[...] = relu_var.astype(var_out_ref.dtype)


def _clt_kernel_no_var(mu_ref, wmu_ref, s2w_ref, bias_ref,
                       mu_out_ref, var_out_ref, mu_acc, var_acc):
    # Specialized var_inp=None path: variance reduces to mu_in^2 @ s2_w.T.
    k = pl.program_id(2)

    @pl.when(k == 0)
    def _init():
        mu_acc[...] = jnp.zeros_like(mu_acc)
        var_acc[...] = jnp.zeros_like(var_acc)

    mu_in = mu_ref[...]
    w_mu = wmu_ref[...]
    s2_w = s2w_ref[...]

    mu_acc[...] += lax.dot_general(mu_in, w_mu, _NT_DIMS,
                                   preferred_element_type=jnp.float32)
    var_acc[...] += lax.dot_general(mu_in * mu_in, s2_w, _NT_DIMS,
                                    preferred_element_type=jnp.float32)

    @pl.when(k == pl.num_programs(2) - 1)
    def _finalize():
        mu_lin = mu_acc[...] + bias_ref[...]
        var_lin = var_acc[...] + 1e-8
        relu_mean, relu_var = _relu_moments(mu_lin, var_lin)
        mu_out_ref[...] = relu_mean.astype(mu_out_ref.dtype)
        var_out_ref[...] = relu_var.astype(var_out_ref.dtype)


def _round_up(x, m):
    return ((x + m - 1) // m) * m


def _pad2d(x, rows, cols):
    pr, pc = rows - x.shape[0], cols - x.shape[1]
    if pr or pc:
        x = jnp.pad(x, ((0, pr), (0, pc)))
    return x


@functools.partial(jax.jit,
                   static_argnames=("compute_dtype", "block_b", "block_n", "block_k"))
def clt_linear_forward(mu_inp, mu_w, logsig2_w, bias, var_inp=None, *,
                       compute_dtype=jnp.bfloat16,
                       block_b=256, block_n=256, block_k=512):
    """Pallas forward of CLTLinear (relu_act=True).

    mu_inp:     (B, n_in)
    mu_w:       (n_out, n_in)   -- PyTorch layout (no transpose needed)
    logsig2_w:  (n_out, n_in)
    bias:       (n_out,)
    var_inp:    optional (B, n_in); None uses the specialized no-variance path.
    Returns (mu_out, var_out), each (B, n_out) float32.
    """
    B, n_in = mu_inp.shape
    n_out = mu_w.shape[0]

    # Tile sizes: lane dims multiples of 128 (lane-dense stores, MXU-friendly),
    # batch tile a multiple of 8 (sublane). Defaults sized well inside v7x's
    # 64 MiB VMEM with 2-deep double buffering of every stream.
    tb = min(block_b, _round_up(B, 8))
    tn = min(block_n, _round_up(n_out, 128))
    tk = min(block_k, _round_up(n_in, 128))
    Bp, Np, Kp = _round_up(B, tb), _round_up(n_out, tn), _round_up(n_in, tk)

    # Hoisted transcendental: exp(logsig2_w) computed once per call (fused
    # elementwise XLA op), not once per batch tile inside the kernel.
    s2_w = jnp.exp(jnp.asarray(logsig2_w, jnp.float32))

    # MXU operands in compute_dtype (bf16 default); accumulation stays f32.
    mu_p = _pad2d(jnp.asarray(mu_inp), Bp, Kp).astype(compute_dtype)
    wmu_p = _pad2d(jnp.asarray(mu_w), Np, Kp).astype(compute_dtype)
    s2w_p = _pad2d(s2_w, Np, Kp).astype(compute_dtype)
    bias_p = _pad2d(jnp.asarray(bias, jnp.float32).reshape(1, n_out), 1, Np)

    grid = (Bp // tb, Np // tn, Kp // tk)

    act_spec = pl.BlockSpec((tb, tk), lambda i, j, k: (i, k))
    w_spec = pl.BlockSpec((tn, tk), lambda i, j, k: (j, k))
    bias_spec = pl.BlockSpec((1, tn), lambda i, j, k: (0, j))
    out_spec = pl.BlockSpec((tb, tn), lambda i, j, k: (i, j))

    if var_inp is None:
        kernel = _clt_kernel_no_var
        in_specs = [act_spec, w_spec, w_spec, bias_spec]
        operands = (mu_p, wmu_p, s2w_p, bias_p)
    else:
        var_p = _pad2d(jnp.asarray(var_inp), Bp, Kp).astype(compute_dtype)
        kernel = _clt_kernel_with_var
        in_specs = [act_spec, act_spec, w_spec, w_spec, bias_spec]
        operands = (mu_p, var_p, wmu_p, s2w_p, bias_p)

    mu_out, var_out = pl.pallas_call(
        kernel,
        out_shape=(jax.ShapeDtypeStruct((Bp, Np), jnp.float32),
                   jax.ShapeDtypeStruct((Bp, Np), jnp.float32)),
        grid_spec=pltpu.PrefetchScalarGridSpec(
            num_scalar_prefetch=0,
            grid=grid,
            in_specs=in_specs,
            out_specs=[out_spec, out_spec],
            scratch_shapes=[pltpu.VMEM((tb, tn), jnp.float32),
                            pltpu.VMEM((tb, tn), jnp.float32)]),
        compiler_params=pltpu.CompilerParams(
            dimension_semantics=("parallel", "parallel", "arbitrary"),
            vmem_limit_bytes=32 * 1024 * 1024),
    )(*operands)

    # Strip the lane/sublane padding.
    return mu_out[:B, :n_out], var_out[:B, :n_out]


def _reference_forward(mu_inp, mu_w, logsig2_w, bias, var_inp=None):
    """Pure-JAX reference mirroring the PyTorch module (relu_act=True)."""
    s2_w = jnp.exp(logsig2_w)
    mu_out = mu_inp @ mu_w.T + bias
    if var_inp is None:
        var_out = (mu_inp ** 2) @ s2_w.T + 1e-8
    else:
        var_out = (var_inp + mu_inp ** 2) @ s2_w.T + var_inp @ (mu_w ** 2).T + 1e-8
    sig = jnp.sqrt(var_out)
    alpha = mu_out / sig
    cdf = 0.5 * (1.0 + lax.erf(alpha / math.sqrt(2.0)))
    pdf = (1.0 / math.sqrt(2.0 * math.pi)) * jnp.exp(-0.5 * alpha ** 2)
    relu_mean = mu_out * cdf + sig * pdf
    relu_var = (sig ** 2 + mu_out ** 2) * cdf + mu_out * sig * pdf - relu_mean ** 2
    relu_var = jnp.maximum(relu_var, 1e-8)
    return relu_mean, relu_var


if __name__ == "__main__":
    # Small, module-consistent shapes: batch=8, in_features=32, out_features=32.
    B, n_in, n_out = 8, 32, 32

    key = jax.random.PRNGKey(0)
    k_mu, k_ls, k_x, k_v = jax.random.split(key, 4)

    # Parameter init mirroring reset_parameters().
    stdv = 1.0 / math.sqrt(n_in)
    mu_w = stdv * jax.random.normal(k_mu, (n_out, n_in), jnp.float32)
    logsig2_w = -9.0 + 0.001 * jax.random.normal(k_ls, (n_out, n_in), jnp.float32)
    bias = jnp.zeros((n_out,), jnp.float32)

    mu_inp = jax.random.normal(k_x, (B, n_in), jnp.float32)
    var_inp = jax.nn.softplus(jax.random.normal(k_v, (B, n_in), jnp.float32))

    # Default (bf16 MXU operand) path, with and without input variance.
    mu_o, var_o = clt_linear_forward(mu_inp, mu_w, logsig2_w, bias, var_inp)
    mu_o0, var_o0 = clt_linear_forward(mu_inp, mu_w, logsig2_w, bias, None)
    # f32 operand path (same kernels, different compute dtype).
    mu_f, var_f = clt_linear_forward(mu_inp, mu_w, logsig2_w, bias, var_inp,
                                     compute_dtype=jnp.float32)
    jax.block_until_ready((mu_o, var_o, mu_o0, var_o0, mu_f, var_f))

    # Correctness vs pure-JAX reference (tolerance covers bf16 matmul operands).
    ref_mu, ref_var = _reference_forward(mu_inp, mu_w, logsig2_w, bias, var_inp)
    ref_mu0, ref_var0 = _reference_forward(mu_inp, mu_w, logsig2_w, bias, None)

    tol = dict(rtol=5e-2, atol=5e-2)
    assert mu_o.shape == (B, n_out) and var_o.shape == (B, n_out)
    assert jnp.allclose(mu_o, ref_mu, **tol), "mu mismatch (var path, bf16)"
    assert jnp.allclose(var_o, ref_var, **tol), "var mismatch (var path, bf16)"
    assert jnp.allclose(mu_o0, ref_mu0, **tol), "mu mismatch (no-var path)"
    assert jnp.allclose(var_o0, ref_var0, **tol), "var mismatch (no-var path)"
    assert jnp.allclose(mu_f, ref_mu, **tol), "mu mismatch (f32 path)"
    assert jnp.allclose(var_f, ref_var, **tol), "var mismatch (f32 path)"

    print("KERNEL_OK")
</pallas_src>

<mosaic_0001>
module attributes {stable_mosaic.version = 11 : i64} {
  func.func @_clt_kernel_with_var(%arg0: i32, %arg1: i32, %arg2: i32, %arg3: memref<8x128xbf16, #tpu.memory_space<vmem>>, %arg4: memref<8x128xbf16, #tpu.memory_space<vmem>>, %arg5: memref<128x128xbf16, #tpu.memory_space<vmem>>, %arg6: memref<128x128xbf16, #tpu.memory_space<vmem>>, %arg7: memref<1x128xf32, #tpu.memory_space<vmem>>, %arg8: memref<8x128xf32, #tpu.memory_space<vmem>>, %arg9: memref<8x128xf32, #tpu.memory_space<vmem>>, %arg10: memref<8x128xf32, #tpu.memory_space<vmem>>, %arg11: memref<8x128xf32, #tpu.memory_space<vmem>>) attributes {dimension_semantics = [#tpu.dimension_semantics<parallel>, #tpu.dimension_semantics<parallel>, #tpu.dimension_semantics<arbitrary>], iteration_bounds = array<i64: 1, 1, 1>, scalar_prefetch = 0 : i64, scratch_operands = 2 : i64, tpu.core_type = #tpu.core_type<tc>, window_params = [{transform_indices = @transform_0, window_bounds = array<i64: 8, 128>}, {transform_indices = @transform_1, window_bounds = array<i64: 8, 128>}, {transform_indices = @transform_2, window_bounds = array<i64: 128, 128>}, {transform_indices = @transform_3, window_bounds = array<i64: 128, 128>}, {transform_indices = @transform_4, window_bounds = array<i64: 1, 128>}, {transform_indices = @transform_5, window_bounds = array<i64: 8, 128>}, {transform_indices = @transform_6, window_bounds = array<i64: 8, 128>}]} {
    %c0_i32 = arith.constant 0 : i32
    %0 = arith.cmpi eq, %arg2, %c0_i32 : i32
    %1 = arith.extui %0 : i1 to i32
    %c0_i32_0 = arith.constant 0 : i32
    %2 = arith.cmpi ne, %1, %c0_i32_0 : i32
    scf.if %2 {
      %cst_24 = arith.constant 0.000000e+00 : f32
      %25 = vector.broadcast %cst_24 : f32 to vector<8x128xf32>
      %c0_25 = arith.constant 0 : index
      %c0_26 = arith.constant 0 : index
      %26 = vector.load %arg10[%c0_25, %c0_26] : memref<8x128xf32, #tpu.memory_space<vmem>>, vector<8x128xf32>
      tpu.vector_store %arg10[%c0_25, %c0_26], %25 {strides = array<i32>} : memref<8x128xf32, #tpu.memory_space<vmem>>, vector<8x128xf32>,
      %cst_27 = arith.constant 0.000000e+00 : f32
      %27 = vector.broadcast %cst_27 : f32 to vector<8x128xf32>
      %c0_28 = arith.constant 0 : index
      %c0_29 = arith.constant 0 : index
      %28 = vector.load %arg11[%c0_28, %c0_29] : memref<8x128xf32, #tpu.memory_space<vmem>>, vector<8x128xf32>
      tpu.vector_store %arg11[%c0_28, %c0_29], %27 {strides = array<i32>} : memref<8x128xf32, #tpu.memory_space<vmem>>, vector<8x128xf32>,
    } else {
    }
    %c0 = arith.constant 0 : index
    %c0_1 = arith.constant 0 : index
    %3 = vector.load %arg3[%c0, %c0_1] : memref<8x128xbf16, #tpu.memory_space<vmem>>, vector<8x128xbf16>
    %c0_2 = arith.constant 0 : index
    %c0_3 = arith.constant 0 : index
    %4 = vector.load %arg4[%c0_2, %c0_3] : memref<8x128xbf16, #tpu.memory_space<vmem>>, vector<8x128xbf16>
    %c0_4 = arith.constant 0 : index
    %c0_5 = arith.constant 0 : index
    %5 = vector.load %arg5[%c0_4, %c0_5] : memref<128x128xbf16, #tpu.memory_space<vmem>>, vector<128x128xbf16>
    %c0_6 = arith.constant 0 : index
    %c0_7 = arith.constant 0 : index
    %6 = vector.load %arg6[%c0_6, %c0_7] : memref<128x128xbf16, #tpu.memory_space<vmem>>, vector<128x128xbf16>
    %c0_8 = arith.constant 0 : index
    %c0_9 = arith.constant 0 : index
    %7 = vector.load %arg10[%c0_8, %c0_9] : memref<8x128xf32, #tpu.memory_space<vmem>>, vector<8x128xf32>
    %cst = arith.constant dense<0.000000e+00> : vector<8x128xf32>
    %8 = tpu.matmul %3, %5, %cst {dimension_numbers = #tpu.dot_dimension_numbers<[1], [1], [0], [0], [0, 0, 1, 0], [], []>} : vector<8x128xbf16>, vector<128x128xbf16>, vector<8x128xf32> -> vector<8x128xf32>
    %9 = arith.addf %7, %8 : vector<8x128xf32>
    %c0_10 = arith.constant 0 : index
    %c0_11 = arith.constant 0 : index
    %10 = vector.load %arg10[%c0_10, %c0_11] : memref<8x128xf32, #tpu.memory_space<vmem>>, vector<8x128xf32>
    tpu.vector_store %arg10[%c0_10, %c0_11], %9 {strides = array<i32>} : memref<8x128xf32, #tpu.memory_space<vmem>>, vector<8x128xf32>,
    %c0_12 = arith.constant 0 : index
    %c0_13 = arith.constant 0 : index
    %11 = vector.load %arg11[%c0_12, %c0_13] : memref<8x128xf32, #tpu.memory_space<vmem>>, vector<8x128xf32>
    %12 = arith.mulf %3, %3 : vector<8x128xbf16>
    %13 = arith.addf %4, %12 : vector<8x128xbf16>
    %cst_14 = arith.constant dense<0.000000e+00> : vector<8x128xf32>
    %14 = tpu.matmul %13, %6, %cst_14 {dimension_numbers = #tpu.dot_dimension_numbers<[1], [1], [0], [0], [0, 0, 1, 0], [], []>} : vector<8x128xbf16>, vector<128x128xbf16>, vector<8x128xf32> -> vector<8x128xf32>
    %15 = arith.addf %11, %14 : vector<8x128xf32>
    %c0_15 = arith.constant 0 : index
    %c0_16 = arith.constant 0 : index
    %16 = vector.load %arg11[%c0_15, %c0_16] : memref<8x128xf32, #tpu.memory_space<vmem>>, vector<8x128xf32>
    tpu.vector_store %arg11[%c0_15, %c0_16], %15 {strides = array<i32>} : memref<8x128xf32, #tpu.memory_space<vmem>>, vector<8x128xf32>,
    %c0_17 = arith.constant 0 : index
    %c0_18 = arith.constant 0 : index
    %17 = vector.load %arg11[%c0_17, %c0_18] : memref<8x128xf32, #tpu.memory_space<vmem>>, vector<8x128xf32>
    %18 = arith.mulf %5, %5 : vector<128x128xbf16>
    %cst_19 = arith.constant dense<0.000000e+00> : vector<8x128xf32>
    %19 = tpu.matmul %4, %18, %cst_19 {dimension_numbers = #tpu.dot_dimension_numbers<[1], [1], [0], [0], [0, 0, 1, 0], [], []>} : vector<8x128xbf16>, vector<128x128xbf16>, vector<8x128xf32> -> vector<8x128xf32>
    %20 = arith.addf %17, %19 : vector<8x128xf32>
    %c0_20 = arith.constant 0 : index
    %c0_21 = arith.constant 0 : index
    %21 = vector.load %arg11[%c0_20, %c0_21] : memref<8x128xf32, #tpu.memory_space<vmem>>, vector<8x128xf32>
    tpu.vector_store %arg11[%c0_20, %c0_21], %20 {strides = array<i32>} : memref<8x128xf32, #tpu.memory_space<vmem>>, vector<8x128xf32>,
    %c0_i32_22 = arith.constant 0 : i32
    %22 = arith.cmpi eq, %arg2, %c0_i32_22 : i32
    %23 = arith.extui %22 : i1 to i32
    %c0_i32_23 = arith.constant 0 : i32
    %24 = arith.cmpi ne, %23, %c0_i32_23 : i32
    scf.if %24 {
      %c0_24 = arith.constant 0 : index
      %c0_25 = arith.constant 0 : index
      %25 = vector.load %arg10[%c0_24, %c0_25] : memref<8x128xf32, #tpu.memory_space<vmem>>, vector<8x128xf32>
      %c0_26 = arith.constant 0 : index
      %c0_27 = arith.constant 0 : index
      %26 = vector.load %arg7[%c0_26, %c0_27] : memref<1x128xf32, #tpu.memory_space<vmem>>, vector<1x128xf32>
      %27 = vector.broadcast %26 : vector<1x128xf32> to vector<8x128xf32>
      %28 = arith.addf %25, %27 : vector<8x128xf32>
      %c0_28 = arith.constant 0 : index
      %c0_29 = arith.constant 0 : index
      %29 = vector.load %arg11[%c0_28, %c0_29] : memref<8x128xf32, #tpu.memory_space<vmem>>, vector<8x128xf32>
      %cst_30 = arith.constant 9.99999993E-9 : f32
      %30 = vector.broadcast %cst_30 : f32 to vector<8x128xf32>
      %31 = arith.addf %29, %30 : vector<8x128xf32>
      %32 = math.rsqrt %31 : vector<8x128xf32>
      %33 = arith.mulf %31, %32 : vector<8x128xf32>
      %34 = arith.mulf %28, %32 : vector<8x128xf32>
      %cst_31 = arith.constant 0.707106769 : f32
      %35 = vector.broadcast %cst_31 : f32 to vector<8x128xf32>
      %36 = arith.mulf %34, %35 : vector<8x128xf32>
      %37 = math.erf %36 : vector<8x128xf32>
      %cst_32 = arith.constant 1.000000e+00 : f32
      %38 = vector.broadcast %cst_32 : f32 to vector<8x128xf32>
      %39 = arith.addf %38, %37 : vector<8x128xf32>
      %cst_33 = arith.constant 5.000000e-01 : f32
      %40 = vector.broadcast %cst_33 : f32 to vector<8x128xf32>
      %41 = arith.mulf %40, %39 : vector<8x128xf32>
      %cst_34 = arith.constant -5.000000e-01 : f32
      %42 = vector.broadcast %cst_34 : f32 to vector<8x128xf32>
      %43 = arith.mulf %42, %34 : vector<8x128xf32>
      %44 = arith.mulf %43, %34 : vector<8x128xf32>
      %45 = math.exp %44 : vector<8x128xf32>
      %cst_35 = arith.constant 0.398942292 : f32
      %46 = vector.broadcast %cst_35 : f32 to vector<8x128xf32>
      %47 = arith.mulf %46, %45 : vector<8x128xf32>
      %48 = arith.mulf %28, %41 : vector<8x128xf32>
      %49 = arith.mulf %33, %47 : vector<8x128xf32>
      %50 = arith.addf %48, %49 : vector<8x128xf32>
      %51 = arith.mulf %28, %28 : vector<8x128xf32>
      %52 = arith.addf %31, %51 : vector<8x128xf32>
      %53 = arith.mulf %52, %41 : vector<8x128xf32>
      %54 = arith.mulf %28, %33 : vector<8x128xf32>
      %55 = arith.mulf %54, %47 : vector<8x128xf32>
      %56 = arith.addf %53, %55 : vector<8x128xf32>
      %57 = arith.mulf %50, %50 : vector<8x128xf32>
      %58 = arith.subf %56, %57 : vector<8x128xf32>
      %cst_36 = arith.constant 9.99999993E-9 : f32
      %59 = vector.broadcast %cst_36 : f32 to vector<8x128xf32>
      %60 = arith.maximumf %58, %59 : vector<8x128xf32>
      %c0_37 = arith.constant 0 : index
      %c0_38 = arith.constant 0 : index
      %61 = vector.load %arg8[%c0_37, %c0_38] : memref<8x128xf32, #tpu.memory_space<vmem>>, vector<8x128xf32>
      tpu.vector_store %arg8[%c0_37, %c0_38], %50 {strides = array<i32>} : memref<8x128xf32, #tpu.memory_space<vmem>>, vector<8x128xf32>,
      %c0_39 = arith.constant 0 : index
      %c0_40 = arith.constant 0 : index
      %62 = vector.load %arg9[%c0_39, %c0_40] : memref<8x128xf32, #tpu.memory_space<vmem>>, vector<8x128xf32>
      tpu.vector_store %arg9[%c0_39, %c0_40], %60 {strides = array<i32>} : memref<8x128xf32, #tpu.memory_space<vmem>>, vector<8x128xf32>,
    } else {
    }
    return
  }
  func.func @transform_0(%arg0: i32, %arg1: i32, %arg2: i32) -> (i32, i32) {
    %c0_i32 = arith.constant 0 : i32
    return %arg0, %arg2 : i32, i32
  }
  func.func @transform_1(%arg0: i32, %arg1: i32, %arg2: i32) -> (i32, i32) {
    %c0_i32 = arith.constant 0 : i32
    return %arg0, %arg2 : i32, i32
  }
  func.func @transform_2(%arg0: i32, %arg1: i32, %arg2: i32) -> (i32, i32) {
    %c0_i32 = arith.constant 0 : i32
    return %arg1, %arg2 : i32, i32
  }
  func.func @transform_3(%arg0: i32, %arg1: i32, %arg2: i32) -> (i32, i32) {
    %c0_i32 = arith.constant 0 : i32
    return %arg1, %arg2 : i32, i32
  }
  func.func @transform_4(%arg0: i32, %arg1: i32, %arg2: i32) -> (i32, i32) {
    %c0_i32 = arith.constant 0 : i32
    %c0_i32_0 = arith.constant 0 : i32
    return %c0_i32, %arg1 : i32, i32
  }
  func.func @transform_5(%arg0: i32, %arg1: i32, %arg2: i32) -> (i32, i32) {
    %c0_i32 = arith.constant 0 : i32
    return %arg0, %arg1 : i32, i32
  }
  func.func @transform_6(%arg0: i32, %arg1: i32, %arg2: i32) -> (i32, i32) {
    %c0_i32 = arith.constant 0 : i32
    return %arg0, %arg1 : i32, i32
  }
}

</mosaic_0001>

<bundles_post_ra>
// kernel: clt_linear_forward.1
= control target key start
LH: loop header
LB: loop body
LE: loop exit
PB: predicated region body
PF: predicated region fallthrough
CT: control target
= control target key end

     0   :  { %12 = vsyncpa [#allocation5], 0  ;;  %v606_v3 = vmov 0.0   ;;  %vm607_vm0 = vmmov 0   ;;  %s802_s0 = inlined_call_operand.vmem [shape: bf16[8,128], index: 0, kind: input, shape index: {}]   ;;  %s803_s1 = inlined_call_operand.vmem [shape: bf16[8,128], index: 1, kind: input, shape index: {}]   ;;  %s804_s2 = inlined_call_operand.vmem [shape: bf16[128,128], index: 2, kind: input, shape index: {}]   ;;  %s805_s3 = inlined_call_operand.vmem [shape: bf16[128,128], index: 3, kind: input, shape index: {}]   ;;  %s806_s4 = inlined_call_operand.vmem [shape: f32[1,128], index: 4, kind: input, shape index: {}]   ;;  %s807_s5 = inlined_call_operand.hbm [shape: f32[8,128], index: 5, kind: output, shape index: {0}]   ;;  %s808_s6 = inlined_call_operand.hbm [shape: f32[8,128], index: 6, kind: output, shape index: {1}]  }
   0x1   :  { %v648_v0 = vld [vmem:[%s804_s2 + $0x38] sm:$0xf]  ;;  %v653_v1 = vld [vmem:[%s804_s2 + $0x3c] sm:$0xf]  ;;  %476 = vmatprep.subr.bf16.mxu0 %v606_v3  ;;  %496 = vmatprep.subr.bf16.mxu1 %v606_v3  ;;  %v666_v5 = vld [vmem:[%s804_s2 + $0x30] sm:$0xf] }
   0x2   :  { %v548_v2 = vld [vmem:[%s805_s3 + $0x38] sm:$0xff]   ;;  %v431_v4 = vcombine.low %v648_v0, %v653_v1  ;;  %v671_v6 = vld [vmem:[%s804_s2 + $0x34] sm:$0xf]  ;;  %492 = vmatprep.mubr.msk.bf16.mxu0 %vm607_vm0, %v606_v3  ;;  %512 = vmatprep.mubr.msk.bf16.mxu1 %vm607_vm0, %v606_v3  ;;  %v686_v9 = vld [vmem:[%s804_s2 + $0x28] sm:$0xf] }
   0x3   :  { %497 = vmatpush3.bf16.xpose.msra.mxu1 %v548_v2  ;;  %v430_v7 = vcombine.low %v666_v5, %v671_v6  ;;  %v549_v8 = vld [vmem:[%s805_s3 + $0x30] sm:$0xff]   ;;  %v693_v10 = vld [vmem:[%s804_s2 + $0x2c] sm:$0xf] }
   0x4   :  { %477 = vmatpush3.bf16.xpose.msra.mxu0 %v431_v4  ;;  %498 = vmatprep.subr.bf16.mxu1 %v606_v3  ;;  %v550_v11 = vld [vmem:[%s805_s3 + $0x28] sm:$0xff]  }
   0x5   :  { %478 = vmatprep.subr.bf16.mxu0 %v606_v3 }
   0xb   :  { %499 = vmatpush3.bf16.xpose.msra.mxu1 %v549_v8 }
   0xc   :  { %479 = vmatpush3.bf16.xpose.msra.mxu0 %v430_v7  ;;  %500 = vmatprep.subr.bf16.mxu1 %v606_v3 }
   0xd   :  { %480 = vmatprep.subr.bf16.mxu0 %v606_v3 }
   0xe   :  { %13 = vsyncpa [#allocation7], 0  ;;  %v429_v12 = vcombine.low %v686_v9, %v693_v10  ;;  %v705_v13 = vld [vmem:[%s804_s2 + $0x20] sm:$0xf]  ;;  %v710_v14 = vld [vmem:[%s804_s2 + $0x24] sm:$0xf]  ;;  %v264_v36 = vmul.bf16 %v648_v0, %v648_v0  ;;  %v265_v37 = vmul.bf16 %v653_v1, %v653_v1  ;;  %v262_v40 = vmul.bf16 %v666_v5, %v666_v5 }
   0xf   :  { %v551_v15 = vld [vmem:[%s805_s3 + $0x20] sm:$0xff]   ;;  %v428_v16 = vcombine.low %v705_v13, %v710_v14  ;;  %v39_v17 = vld [vmem:[%s804_s2 + $0x18] sm:$0xf]  ;;  %v40_v18 = vld [vmem:[%s804_s2 + $0x1c] sm:$0xf]  ;;  %v263_v41 = vmul.bf16 %v671_v6, %v671_v6  ;;  %v260_v43 = vmul.bf16 %v686_v9, %v686_v9  ;;  %v261_v44 = vmul.bf16 %v693_v10, %v693_v10 }
  0x10   :  { %v552_v19 = vld [vmem:[%s805_s3 + $0x18] sm:$0xff]   ;;  %v427_v20 = vcombine.low %v39_v17, %v40_v18  ;;  %v37_v21 = vld [vmem:[%s804_s2 + $0x10] sm:$0xf]  ;;  %v38_v22 = vld [vmem:[%s804_s2 + $0x14] sm:$0xf]  ;;  %v447_v39 = vcombine.low %v264_v36, %v265_v37  ;;  %v258_v46 = vmul.bf16 %v705_v13, %v705_v13  ;;  %v259_v47 = vmul.bf16 %v710_v14, %v710_v14 }
  0x11   :  { %v553_v23 = vld [vmem:[%s805_s3 + $0x10] sm:$0xff]   ;;  %v426_v24 = vcombine.low %v37_v21, %v38_v22  ;;  %v35_v25 = vld [vmem:[%s804_s2 + $0x8] sm:$0xf]  ;;  %v36_v26 = vld [vmem:[%s804_s2 + $0xc] sm:$0xf]  ;;  %v446_v42 = vcombine.low %v262_v40, %v263_v41  ;;  %v445_v45 = vcombine.low %v260_v43, %v261_v44  ;;  %v256_v49 = vmul.bf16 %v39_v17, %v39_v17 }
  0x12   :  { %v554_v27 = vld [vmem:[%s805_s3 + $0x8] sm:$0xff]   ;;  %v425_v28 = vcombine.low %v35_v25, %v36_v26  ;;  %v33_v29 = vld [vmem:[%s804_s2] sm:$0xf]  ;;  %v34_v30 = vld [vmem:[%s804_s2 + $0x4] sm:$0xf]  ;;  %v444_v48 = vcombine.low %v258_v46, %v259_v47  ;;  %v257_v50 = vmul.bf16 %v40_v18, %v40_v18  ;;  %v254_v52 = vmul.bf16 %v37_v21, %v37_v21  ;;  %s608_s2 = smov [#allocation4]  }
  0x13   :  { %501 = vmatpush3.bf16.xpose.msra.mxu1 %v550_v11  ;;  %v555_v31 = vld [vmem:[%s805_s3] sm:$0xff]   ;;  %v424_v32 = vcombine.low %v33_v29, %v34_v30  ;;  %v255_v53 = vmul.bf16 %v38_v22, %v38_v22  ;;  %v252_v55 = vmul.bf16 %v35_v25, %v35_v25  ;;  %v253_v56 = vmul.bf16 %v36_v26, %v36_v26  ;;  %s402_s3 = sshll.u32 %s608_s2, 4  ;;  %s403_s3 = int_to_ptr.vmem [resolvable:$true] %s402_s3 }
  0x14   :  { %481 = vmatpush3.bf16.xpose.msra.mxu0 %v429_v12  ;;  %502 = vmatprep.subr.bf16.mxu1 %v606_v3  ;;  %v31_v33 = vld [vmem:[%s802_s0] sm:$0xf]  ;;  %v443_v51 = vcombine.low %v256_v49, %v257_v50  ;;  %v250_v58 = vmul.bf16 %v33_v29, %v33_v29  ;;  %v251_v59 = vmul.bf16 %v34_v30, %v34_v30  ;;  %s562_s26 = scalar_lea.vmem %s403_s3, 128  ;;  %p567_p1 = scmp.lt.s32.totalorder %s403_s3, %s403_s3 }
  0x15   :  { %482 = vmatprep.subr.bf16.mxu0 %v606_v3  ;;  %v157_v34 = vmul.bf16 %v31_v33, %v31_v33  ;;  %v32_v35 = vld [vmem:[%s803_s1] sm:$0xf]  ;;  %v442_v54 = vcombine.low %v254_v52, %v255_v53  ;;  %v441_v57 = vcombine.low %v252_v55, %v253_v56  ;;  %p563_p0 = scmp.ne.s32.totalorder %s403_s3, %s562_s26  ;;  %p568_p2 = scmp.lt.s32.totalorder %s562_s26, %s562_s26 }
  0x16   :  { %v440_v60 = vcombine.low %v250_v58, %v251_v59  ;;  %v448_v6 = vld [vmem:[%s806_s4] ss:$0 sm:$0xff]  ;;  %s609_s4 = smov [#allocation6]  }
  0x17   :  { %v158_v38 = vadd.bf16 %v157_v34, %v32_v35  ;;  %s412_s25 = sshll.u32 %s609_s4, 4  ;;  %p569_p3 = por %p568_p2, %p567_p1  ;;  %s413_s25 = int_to_ptr.vmem [resolvable:$true] %s412_s25 }
  0x19   :  { %p570_p4 = pnand %p569_p3, %p563_p0 }
  0x1b   :  { %503 = vmatpush3.bf16.xpose.msra.mxu1 %v551_v15 }
  0x1c   :  { %483 = vmatpush3.bf16.xpose.msra.mxu0 %v428_v16  ;;  %504 = vmatprep.subr.bf16.mxu1 %v606_v3 }
  0x1d   :  { %484 = vmatprep.subr.bf16.mxu0 %v606_v3 }
  0x23   :  { %505 = vmatpush3.bf16.xpose.msra.mxu1 %v552_v19 }
  0x24   :  { %485 = vmatpush3.bf16.xpose.msra.mxu0 %v427_v20  ;;  %506 = vmatprep.subr.bf16.mxu1 %v606_v3 }
  0x25   :  { %486 = vmatprep.subr.bf16.mxu0 %v606_v3 }
  0x2b   :  { %507 = vmatpush3.bf16.xpose.msra.mxu1 %v553_v23 }
  0x2c   :  { %487 = vmatpush3.bf16.xpose.msra.mxu0 %v426_v24  ;;  %508 = vmatprep.subr.bf16.mxu1 %v606_v3 }
  0x2d   :  { %488 = vmatprep.subr.bf16.mxu0 %v606_v3 }
  0x33   :  { %509 = vmatpush3.bf16.xpose.msra.mxu1 %v554_v27 }
  0x34   :  { %489 = vmatpush3.bf16.xpose.msra.mxu0 %v425_v28  ;;  %510 = vmatprep.subr.bf16.mxu1 %v606_v3 }
  0x35   :  { %490 = vmatprep.subr.bf16.mxu0 %v606_v3 }
  0x3b   :  { %511 = vmatpush3.bf16.xpose.msra.mxu1 %v555_v31 }
  0x3c   :  { %491 = vmatpush3.bf16.xpose.msra.mxu0 %v424_v32 }
  0x3d   :  { %516 = vmatprep.subr.bf16.mxu0 %v606_v3 }
  0x42   :  { %513 = vmatmul.mubr.bf16.vlgmr.msra.gmra.mxu1 %v158_v38 }
  0x43   :  { %493 = vmatmul.mubr.bf16.vlgmr.msra.gmra.mxu0 %v31_v33 }
  0x44   :  { %517 = vmatpush3.bf16.xpose.msra.mxu0 %v447_v39  ;;  %532 = vmatprep.mubr.msk.bf16.mxu0 %vm607_vm0, %v606_v3 }
  0x45   :  { %518 = vmatprep.subr.bf16.mxu0 %v606_v3 }
  0x4c   :  { %519 = vmatpush3.bf16.xpose.msra.mxu0 %v446_v42 }
  0x4d   :  { %520 = vmatprep.subr.bf16.mxu0 %v606_v3 }
  0x54   :  { %521 = vmatpush3.bf16.xpose.msra.mxu0 %v445_v45 }
  0x55   :  { %522 = vmatprep.subr.bf16.mxu0 %v606_v3 }
  0x5c   :  { %523 = vmatpush3.bf16.xpose.msra.mxu0 %v444_v48 }
  0x5d   :  { %524 = vmatprep.subr.bf16.mxu0 %v606_v3 }
  0x64   :  { %525 = vmatpush3.bf16.xpose.msra.mxu0 %v443_v51 }
  0x65   :  { %526 = vmatprep.subr.bf16.mxu0 %v606_v3 }
  0x6c   :  { %527 = vmatpush3.bf16.xpose.msra.mxu0 %v442_v54 }
  0x6d   :  { %528 = vmatprep.subr.bf16.mxu0 %v606_v3 }
  0x74   :  { %529 = vmatpush3.bf16.xpose.msra.mxu0 %v441_v57 }
  0x75   :  { %530 = vmatprep.subr.bf16.mxu0 %v606_v3 }
  0x7c   :  { %531 = vmatpush3.bf16.xpose.msra.mxu0 %v440_v60 }
  0x83   :  { %533 = vmatmul.mubr.bf16.vlgmr.msra.gmra.mxu0 %v32_v35 }
 0x102   :  { %v241_v61 = vpop.f32.mrf.mxu1 }
 0x103   :  { %v148_v62 = vpop.f32.mrf.mxu0 }
 0x104   :  { %v514_v63 = vpop.f32.mrf.mxu1  ;;  %v367_v7 = vadd.f32 %v448_v6, %v148_v62 }
 0x105   :  { %v494_v0 = vpop.f32.mrf.mxu0 }
 0x106   :  { %v244_v1 = vpop.f32.mrf.mxu1  ;;  %v385_v11 = vmul.f32 %v367_v7, %v367_v7 }
 0x107   :  { %v151_v2 = vpop.f32.mrf.mxu0 }
 0x108   :  { %v515_v4 = vpop.f32.mrf.mxu1 }
 0x109   :  { %v495_v5 = vpop.f32.mrf.mxu0 }
 0x143   :  { %v348_v8 = vpop.f32.mrf.mxu0 }
 0x144   :  { %v354_v9 = vadd.f32 %v348_v8, %v241_v61 }
 0x145   :  { %v534_v10 = vpop.f32.mrf.mxu0 }
 0x146   :  { %v369_v3 = vadd.f32 1e-08, %v354_v9 }
 0x147   :  { %v351_v12 = vpop.f32.mrf.mxu0 }
 0x148   :  { %556 = vrsqrt.f32 %v369_v3  ;;  %v386_v13 = vadd.f32 %v385_v11, %v369_v3 }
 0x149   :  { %v535_v14 = vpop.f32.mrf.mxu0 }
 0x155   :  { %v557_v15 = vpop.eup %556 }
 0x156   :  { %v371_v16 = vmul.f32 %v557_v15, %v369_v3  ;;  %v372_v17 = vmul.f32 %v557_v15, %v367_v7 }
 0x158   :  { %v388_v18 = vmul.f32 %v371_v16, %v367_v7  ;;  %v373_v19 = vmul.f32 0.70710677, %v372_v17  ;;  %v377_v20 = vmul.f32 -0.5, %v372_v17 }
 0x15a   :  { %558 = verf.f32 %v373_v19  ;;  %v378_v21 = vmul.f32 %v377_v20, %v372_v17 }
 0x15c   :  { %v379_v22 = vmul.f32 1.442695, %v378_v21 }
 0x15e   :  { %560 = vpow2.f32 %v379_v22 }
 0x167   :  { %v559_v23 = vpop.eup %558 }
 0x168   :  { %v375_v24 = vadd.f32 1.0, %v559_v23 }
 0x16a   :  { %v376_v25 = vmul.f32 0.5, %v375_v24 }
 0x16b   :  { %v561_v26 = vpop.eup %560 }
 0x16c   :  { %v381_v27 = vmul.f32 0.3989423, %v561_v26  ;;  %v382_v28 = vmul.f32 %v376_v25, %v367_v7  ;;  %v387_v29 = vmul.f32 %v386_v13, %v376_v25 }
 0x16e   :  { %v383_v30 = vmul.f32 %v381_v27, %v371_v16  ;;  %v389_v31 = vmul.f32 %v388_v18, %v381_v27 }
 0x170   :  { %v384_v32 = vadd.f32 %v383_v30, %v382_v28  ;;  %v390_v33 = vadd.f32 %v389_v31, %v387_v29 }
 0x172   :  { %v391_v34 = vmul.f32 %v384_v32, %v384_v32  ;;  %394 = vst [vmem:[#allocation4] sm:$0xff] %v384_v32 }
 0x173   :  { %573 = shalt.err (!%p570_p4)
}
 0x174   :  { %405 = dma.vmem_to_hbm [thread:$0]  %s403_s3, 128, %s807_s5, [#allocation5]   ;;  %v392_v35 = vsub.f32 %v390_v33, %v391_v34 }
 0x175   :  { %s582_s29 = scalar_lea.vmem %s413_s25, 128  ;;  %p587_p6 = scmp.lt.s32.totalorder %s413_s25, %s413_s25 }
 0x176   :  { %v393_v36 = vmax.f32 %v392_v35, 1e-08  ;;  %p583_p5 = scmp.ne.s32.totalorder %s413_s25, %s582_s29  ;;  %p588_p7 = scmp.lt.s32.totalorder %s582_s29, %s582_s29 }
 0x178   :  { %395 = vst [vmem:[#allocation6] sm:$0xff] %v393_v36  ;;  %p589_p8 = por %p588_p7, %p587_p6 }
 0x17a   :  { %p590_p9 = pnand %p589_p8, %p583_p5 }
 0x17c   :  { %593 = shalt.err (!%p590_p9)
}
 0x17d   :  { %415 = dma.vmem_to_hbm [thread:$0]  %s413_s25, 128, %s808_s6, [#allocation7]  }
 0x17e   :  { %602 = dma.done.wait [#allocation5], 128  }
 0x17f   :  { %603 = vsyncadd [#allocation5], 4294967168 }
 0x180   :  { %604 = dma.done.wait [#allocation7], 128  }
 0x181   :  { %605 = vsyncadd [#allocation7], 4294967168 }
 0x182   :  { %422 = vsyncpa [#allocation5], 1 }
 0x183   :  { %423 = vsyncpa [#allocation7], 1 }

</bundles_post_ra>
